<compile_context>
chip_gen: v6e
topology: v6e:2x2x1
jax: 0.10.0
libtpu: 0.0.40
codegen_flags: <defaults>
</compile_context>

<pallas_src>
import jax
import jax.numpy as jnp
import numpy as np
from jax.experimental import pallas as pl
from jax.experimental.pallas import tpu as pltpu

N_STOP_BANDS = 2
LANES = 128
SUBLANES = 8
TILE = LANES * SUBLANES  # 1024: full-vreg-aligned padding unit


def _bandstop_kernel(params_ref, x_ref, o_ref):
    """params_ref: SMEM f32[8] =
         [center0, center1, -1/w0^2, -1/w1^2, depth0, depth1, base_g, high_boost]
       x_ref / o_ref: VMEM f32[rows, 128] (rows a multiple of 8)."""
    x = x_ref[...]

    # max over the whole (padded-with-0) tensor; eigenvalues >= 0 so padding is safe.
    max_eigenval = jnp.max(x) + 1e-8
    inv = 2.0 / max_eigenval                 # one exact scalar reciprocal
    norm = x * inv                           # no per-element divide

    # Unrolled band product; all scalar nonlinearities precomputed in wrapper.
    resp = None
    for i in range(N_STOP_BANDS):
        d = norm - params_ref[i]
        att = 1.0 - params_ref[2 * N_STOP_BANDS + i] * jnp.exp(
            d * d * params_ref[N_STOP_BANDS + i])
        resp = att if resp is None else resp * att

    resp = resp * params_ref[3 * N_STOP_BANDS]            # base_gain (sigmoid'ed)
    high_boost = params_ref[3 * N_STOP_BANDS + 1]          # sigmoid(hfb) * 0.5
    resp = jnp.where(norm > 1.5, resp + high_boost, resp)

    o_ref[...] = jnp.clip(resp, 1e-6, 1.5)


def adaptive_band_stop_filter(eigenvalues, band_centers, band_widths,
                              band_depths, base_gain, high_freq_boost):
    """eigenvalues: f32[N]. Returns f32[N] filter response."""
    eigenvalues = eigenvalues.astype(jnp.float32)
    n = eigenvalues.shape[0]

    # Pad to a multiple of 8*128 with 0.0 (eigenvalues >= 0 -> max unaffected;
    # padded lanes stay finite). Padded outputs are sliced off afterwards.
    n_pad = (-n) % TILE
    x = jnp.pad(eigenvalues, (0, n_pad))
    rows = x.shape[0] // LANES
    x2d = x.reshape(rows, LANES)

    # Precompute all scalar nonlinearities here (fuses into one tiny XLA op).
    centers = jnp.clip(band_centers.astype(jnp.float32), 0.1, 1.9)
    widths = jax.nn.sigmoid(band_widths.astype(jnp.float32)) * 0.5 + 0.05
    neg_inv_w2 = -1.0 / (widths * widths)
    depths = jax.nn.sigmoid(band_depths.astype(jnp.float32)) * 0.8
    base_g = jax.nn.sigmoid(base_gain.astype(jnp.float32))
    high_boost = jax.nn.sigmoid(high_freq_boost.astype(jnp.float32)) * 0.5

    params = jnp.concatenate([
        centers, neg_inv_w2, depths,
        jnp.reshape(base_g, (1,)),
        jnp.reshape(high_boost, (1,)),
    ])  # f32[8]

    out2d = pl.pallas_call(
        _bandstop_kernel,
        out_shape=jax.ShapeDtypeStruct((rows, LANES), jnp.float32),
        in_specs=[
            pl.BlockSpec(memory_space=pltpu.SMEM),   # packed scalar params
            pl.BlockSpec(memory_space=pltpu.VMEM),   # eigenvalues (whole array)
        ],
        out_specs=pl.BlockSpec(memory_space=pltpu.VMEM),
    )(params, x2d)

    return out2d.reshape(-1)[:n]


def _reference(eigenvalues, band_centers, band_widths, band_depths,
               base_gain, high_freq_boost):
    """Pure-JAX reference mirroring the PyTorch forward."""
    max_eigenval = jnp.max(eigenvalues) + 1e-8
    norm = eigenvalues / max_eigenval * 2.0
    response = jax.nn.sigmoid(base_gain) * jnp.ones_like(norm)
    for i in range(N_STOP_BANDS):
        center = jnp.clip(band_centers[i], 0.1, 1.9)
        width = jax.nn.sigmoid(band_widths[i]) * 0.5 + 0.05
        depth = jax.nn.sigmoid(band_depths[i]) * 0.8
        response = response * (1.0 - depth * jnp.exp(-((norm - center) / width) ** 2))
    high_boost = jax.nn.sigmoid(high_freq_boost) * 0.5
    response = jnp.where(norm > 1.5, response + high_boost, response)
    return jnp.clip(response, 1e-6, 1.5)


if __name__ == "__main__":
    key = jax.random.PRNGKey(0)

    # Deterministic "parameters" matching the nn.Module __init__ shapes.
    band_centers = jnp.linspace(0.3, 1.2, N_STOP_BANDS)          # (2,)
    band_widths = jnp.ones((N_STOP_BANDS,), jnp.float32) * 0.2   # (2,)
    band_depths = jnp.ones((N_STOP_BANDS,), jnp.float32) * 0.1   # (2,)
    base_gain = jnp.array(1.0, jnp.float32)                      # scalar
    high_freq_boost = jnp.array(0.0, jnp.float32)                # scalar

    # Eigenvalues: small 1-D spectrum (e.g. of a 256-node graph Laplacian).
    eigenvalues = jax.random.uniform(key, (256,), jnp.float32, 0.0, 2.0)

    out = adaptive_band_stop_filter(eigenvalues, band_centers, band_widths,
                                    band_depths, base_gain, high_freq_boost)
    out = jax.block_until_ready(out)

    ref = _reference(eigenvalues, band_centers, band_widths, band_depths,
                     base_gain, high_freq_boost)
    np.testing.assert_allclose(np.asarray(out), np.asarray(ref),
                               rtol=1e-5, atol=1e-5)
    print("KERNEL_OK")
</pallas_src>

<mosaic_0001>
module attributes {stable_mosaic.version = 11 : i64} {
  func.func @_bandstop_kernel(%arg0: memref<8xf32, #tpu.memory_space<smem>>, %arg1: memref<8x128xf32, #tpu.memory_space<vmem>>, %arg2: memref<8x128xf32, #tpu.memory_space<vmem>>) attributes {dimension_semantics = [], scalar_prefetch = 0 : i64, scratch_operands = 0 : i64, tpu.core_type = #tpu.core_type<tc>} {
    %c0 = arith.constant 0 : index
    %c0_0 = arith.constant 0 : index
    %0 = vector.load %arg1[%c0, %c0_0] : memref<8x128xf32, #tpu.memory_space<vmem>>, vector<8x128xf32>
    %1 = vector.shape_cast %0 : vector<8x128xf32> to vector<1x8x128xf32>
    %cst = arith.constant dense<0xFF800000> : vector<1xf32>
    %2 = vector.multi_reduction <maximumf>, %1, %cst [1, 2] : vector<1x8x128xf32> to vector<1xf32>
    %3 = vector.shape_cast %2 : vector<1xf32> to vector<1x1x1xf32>
    %4 = vector.extract %3[0, 0, 0] : f32 from vector<1x1x1xf32>
    %cst_1 = arith.constant 9.99999993E-9 : f32
    %5 = arith.addf %4, %cst_1 : f32
    %cst_2 = arith.constant 2.000000e+00 : f32
    %6 = arith.divf %cst_2, %5 : f32
    %7 = vector.broadcast %6 : f32 to vector<8x128xf32>
    %8 = arith.mulf %0, %7 : vector<8x128xf32>
    %c0_3 = arith.constant 0 : index
    %9 = memref.load %arg0[%c0_3] : memref<8xf32, #tpu.memory_space<smem>>
    %10 = vector.broadcast %9 : f32 to vector<8x128xf32>
    %11 = arith.subf %8, %10 : vector<8x128xf32>
    %c4 = arith.constant 4 : index
    %12 = memref.load %arg0[%c4] : memref<8xf32, #tpu.memory_space<smem>>
    %13 = arith.mulf %11, %11 : vector<8x128xf32>
    %c2 = arith.constant 2 : index
    %14 = memref.load %arg0[%c2] : memref<8xf32, #tpu.memory_space<smem>>
    %15 = vector.broadcast %14 : f32 to vector<8x128xf32>
    %16 = arith.mulf %13, %15 : vector<8x128xf32>
    %17 = math.exp %16 : vector<8x128xf32>
    %18 = vector.broadcast %12 : f32 to vector<8x128xf32>
    %19 = arith.mulf %18, %17 : vector<8x128xf32>
    %cst_4 = arith.constant 1.000000e+00 : f32
    %20 = vector.broadcast %cst_4 : f32 to vector<8x128xf32>
    %21 = arith.subf %20, %19 : vector<8x128xf32>
    %c1 = arith.constant 1 : index
    %22 = memref.load %arg0[%c1] : memref<8xf32, #tpu.memory_space<smem>>
    %23 = vector.broadcast %22 : f32 to vector<8x128xf32>
    %24 = arith.subf %8, %23 : vector<8x128xf32>
    %c5 = arith.constant 5 : index
    %25 = memref.load %arg0[%c5] : memref<8xf32, #tpu.memory_space<smem>>
    %26 = arith.mulf %24, %24 : vector<8x128xf32>
    %c3 = arith.constant 3 : index
    %27 = memref.load %arg0[%c3] : memref<8xf32, #tpu.memory_space<smem>>
    %28 = vector.broadcast %27 : f32 to vector<8x128xf32>
    %29 = arith.mulf %26, %28 : vector<8x128xf32>
    %30 = math.exp %29 : vector<8x128xf32>
    %31 = vector.broadcast %25 : f32 to vector<8x128xf32>
    %32 = arith.mulf %31, %30 : vector<8x128xf32>
    %cst_5 = arith.constant 1.000000e+00 : f32
    %33 = vector.broadcast %cst_5 : f32 to vector<8x128xf32>
    %34 = arith.subf %33, %32 : vector<8x128xf32>
    %35 = arith.mulf %21, %34 : vector<8x128xf32>
    %c6 = arith.constant 6 : index
    %36 = memref.load %arg0[%c6] : memref<8xf32, #tpu.memory_space<smem>>
    %37 = vector.broadcast %36 : f32 to vector<8x128xf32>
    %38 = arith.mulf %35, %37 : vector<8x128xf32>
    %c7 = arith.constant 7 : index
    %39 = memref.load %arg0[%c7] : memref<8xf32, #tpu.memory_space<smem>>
    %cst_6 = arith.constant 1.500000e+00 : f32
    %40 = vector.broadcast %cst_6 : f32 to vector<8x128xf32>
    %41 = arith.cmpf ogt, %8, %40 : vector<8x128xf32>
    %42 = vector.broadcast %39 : f32 to vector<8x128xf32>
    %43 = arith.addf %38, %42 : vector<8x128xf32>
    %44 = arith.select %41, %43, %38 : vector<8x128xi1>, vector<8x128xf32>
    %cst_7 = arith.constant 9.99999997E-7 : f32
    %cst_8 = arith.constant 1.500000e+00 : f32
    %45 = vector.broadcast %cst_7 : f32 to vector<8x128xf32>
    %46 = arith.maximumf %45, %44 : vector<8x128xf32>
    %47 = vector.broadcast %cst_8 : f32 to vector<8x128xf32>
    %48 = arith.minimumf %47, %46 : vector<8x128xf32>
    %c0_9 = arith.constant 0 : index
    %c0_10 = arith.constant 0 : index
    %49 = vector.load %arg2[%c0_9, %c0_10] : memref<8x128xf32, #tpu.memory_space<vmem>>, vector<8x128xf32>
    tpu.vector_store %arg2[%c0_9, %c0_10], %48 {strides = array<i32>} : memref<8x128xf32, #tpu.memory_space<vmem>>, vector<8x128xf32>,
    return
  }
}

</mosaic_0001>

<bundles_post_ra>
// kernel: tpu_custom_call.1
= control target key start
LH: loop header
LB: loop body
LE: loop exit
PB: predicated region body
PF: predicated region fallthrough
CT: control target
= control target key end

     0   :  { %7 = vsyncpa [#allocation5], 0  ;;  %s207_s0 = inlined_call_operand.hbm [shape: f32[8], index: 0, kind: input, shape index: {}]   ;;  %s208_s1 = inlined_call_operand.hbm [shape: f32[8,128], index: 1, kind: input, shape index: {}]   ;;  %s209_s2 = inlined_call_operand.hbm [shape: f32[8,128], index: 2, kind: output, shape index: {}]  }
   0x1   :  { %8 = vsyncpa [#allocation3], 0 }
   0x2   :  { %9 = vsyncpa [#allocation4], 0  ;;  %s180_s9 = smov [#allocation2]   ;;  %s181_s12 = smov [#allocation6]  }
   0x3   :  { %17 = dma.hbm_to_smem %s207_s0, 16, %s180_s9, [#allocation5]  }
   0x4   :  { %s24_s13 = sshll.u32 %s181_s12, 4  ;;  %s25_s13 = int_to_ptr.vmem [resolvable:$true] %s24_s13 }
   0x5   :  { %s142_s14 = scalar_lea.vmem %s25_s13, 128  ;;  %p147_p1 = scmp.lt.s32.totalorder %s25_s13, %s25_s13 }
   0x6   :  { %p143_p0 = scmp.ne.s32.totalorder %s25_s13, %s142_s14  ;;  %p148_p2 = scmp.lt.s32.totalorder %s142_s14, %s142_s14 }
   0x8   :  { %p149_p3 = por %p148_p2, %p147_p1 }
   0xa   :  { %p150_p4 = pnand %p149_p3, %p143_p0 }
   0xc   :  { %153 = shalt.err (!%p150_p4)
}
   0xd   :  { %27 = dma.hbm_to_vmem [thread:$0]  %s208_s1, 128, %s25_s13, [#allocation3]  }
   0xe   :  { %174 = dma.done.wait [#allocation5], 16  }
   0xf   :  { %175 = vsyncadd [#allocation5], 4294967280 }
  0x10   :  { %176 = dma.done.wait [#allocation3], 128  }
  0x11   :  { %177 = vsyncadd [#allocation3], 4294967168 }
  0x12   :  { %34 = sfence }
  0x13   :  { %v35_v0 = vld [vmem:[#allocation6] sm:$0xff]  ;;  %s52_s1 = sld [smem:[#allocation2]]  ;;  %s182_s27 = smov [#allocation7]  }
  0x14   :  { %36 = vmax.xlane.f32.xlu0 %v35_v0  ;;  %s108_s18 = sld [smem:[#allocation2 + $0x1]]  ;;  %s96_s28 = sshll.u32 %s182_s27, 4  ;;  %s97_s28 = int_to_ptr.vmem [resolvable:$true] %s96_s28 }
  0x15   :  { %s107_s19 = sld [smem:[#allocation2 + $0x2]]  ;;  %s154_s29 = scalar_lea.vmem %s97_s28, 128 }
  0x16   :  { %s110_s20 = sld [smem:[#allocation2 + $0x3]]  ;;  %p155_p5 = scmp.ne.s32.totalorder %s97_s28, %s154_s29 }
  0x17   :  { %s106_s23 = sld [smem:[#allocation2 + $0x4]]  ;;  %p159_p6 = scmp.lt.s32.totalorder %s97_s28, %s97_s28 }
  0x18   :  { %s109_s24 = sld [smem:[#allocation2 + $0x5]]  ;;  %p160_p7 = scmp.lt.s32.totalorder %s154_s29, %s154_s29 }
  0x19   :  { %v53_v11 = vstv %s52_s1  ;;  %s111_s25 = sld [smem:[#allocation2 + $0x6]] }
  0x1a   :  { %v66_v12 = vstv %s108_s18  ;;  %s112_s26 = sld [smem:[#allocation2 + $0x7]]  ;;  %p161_p8 = por %p160_p7, %p159_p6 }
  0x1b   :  { %v58_v16 = vstv %s107_s19 }
  0x1c   :  { %v71_v17 = vstv %s110_s20  ;;  %p162_p9 = pnand %p161_p8, %p155_p5 }
  0x1d   :  { %v62_v24 = vstv %s106_s23 }
  0x1e   :  { %v75_v25 = vstv %s109_s24 }
  0x1f   :  { %v80_v32 = vstv %s111_s25 }
  0x20   :  { %v84_v34 = vstv %s112_s26 }
  0x9d   :  { %v37_v1 = vpop.xlane.xlu0 %36 }
  0x9e   :  { %v38_v2 = vrot.slane %v37_v1, 4 }
  0xa0   :  { %v39_v3 = vmax.f32 %v37_v1, %v38_v2 }
  0xa2   :  { %v40_v4 = vrot.slane %v39_v3, 2 }
  0xa4   :  { %v41_v5 = vmax.f32 %v39_v3, %v40_v4 }
  0xa6   :  { %v42_v6 = vrot.slane %v41_v5, 1 }
  0xa8   :  { %v43_v7 = vmax.f32 %v41_v5, %v42_v6 }
  0xaa   :  { %113 = vpush %v43_v7 }
  0xdb   :  { %s114_s0 = spop %113 }
  0xdc   :  { %s45_s17 = sadd.f32 1e-08, %s114_s0 }
  0xde   :  { %v46_v8 = vstv %s45_s17 }
  0xdf   :  { %120 = vrcp.f32 %v46_v8 }
  0xec   :  { %v121_v9 = vpop.eup %120 }
  0xed   :  { %115 = vpush %v121_v9 }
 0x11e   :  { %s116_s21 = spop %115 }
 0x11f   :  { %s49_s22 = smul.f32 2.0, %s116_s21 }
 0x121   :  { %v50_v10 = vstv %s49_s22 }
 0x122   :  { %v51_v13 = vmul.f32 %v50_v10, %v35_v0 }
 0x124   :  { %v54_v14 = vsub.f32 %v51_v13, %v53_v11  ;;  %v67_v15 = vsub.f32 %v51_v13, %v66_v12  ;;  %vm83_vm0 = vcmp.gt.f32.partialorder %v51_v13, 1.5 }
 0x126   :  { %v56_v18 = vmul.f32 %v54_v14, %v54_v14  ;;  %v69_v19 = vmul.f32 %v67_v15, %v67_v15 }
 0x128   :  { %v59_v20 = vmul.f32 %v58_v16, %v56_v18  ;;  %v72_v21 = vmul.f32 %v71_v17, %v69_v19 }
 0x12a   :  { %v60_v22 = vmul.f32 1.442695, %v59_v20  ;;  %v73_v23 = vmul.f32 1.442695, %v72_v21 }
 0x12c   :  { %122 = vpow2.f32 %v60_v22 }
 0x12d   :  { %124 = vpow2.f32 %v73_v23 }
 0x139   :  { %v123_v26 = vpop.eup %122 }
 0x13a   :  { %v125_v27 = vpop.eup %124  ;;  %v63_v28 = vmul.f32 %v123_v26, %v62_v24 }
 0x13b   :  { %v76_v29 = vmul.f32 %v125_v27, %v75_v25 }
 0x13c   :  { %v64_v30 = vsub.f32 1.0, %v63_v28 }
 0x13d   :  { %v77_v31 = vsub.f32 1.0, %v76_v29 }
 0x13f   :  { %v78_v33 = vmul.f32 %v77_v31, %v64_v30 }
 0x141   :  { %v81_v35 = vmul.f32 %v80_v32, %v78_v33 }
 0x143   :  { %v85_v36 = vadd.f32 %v84_v34, %v81_v35 }
 0x145   :  { %v86_v37 = vsel %vm83_vm0, %v85_v36, %v81_v35 }
 0x146   :  { %v87_v38 = vmax.f32 %v86_v37, 1e-06 }
 0x148   :  { %v88_v39 = vmin.f32 %v87_v38, 1.5 }
 0x14a   :  { %89 = vst [vmem:[#allocation7] sm:$0xff] %v88_v39 }
 0x14b   :  { %165 = shalt.err (!%p162_p9)
}
 0x14c   :  { %99 = dma.vmem_to_hbm [thread:$0]  %s97_s28, 128, %s209_s2, [#allocation4]  }
 0x14d   :  { %178 = dma.done.wait [#allocation4], 128  }
 0x14e   :  { %179 = vsyncadd [#allocation4], 4294967168 }
 0x14f   :  { %103 = vsyncpa [#allocation3], 1 }
 0x150   :  { %104 = vsyncpa [#allocation4], 1 }
 0x151   :  { %105 = vsyncpa [#allocation5], 1 }

</bundles_post_ra>
